<compile_context>
chip_gen: v7x
topology: tpu7x:2x2x1
jax: 0.10.0
libtpu: 0.0.40
codegen_flags: <defaults>
</compile_context>

<pallas_src>
import math

import jax
import jax.numpy as jnp
from jax.experimental import pallas as pl
from jax.experimental.pallas import tpu as pltpu


def _cdiv(a: int, b: int) -> int:
  return -(-a // b)


def _round_up(x: int, m: int) -> int:
  return _cdiv(x, m) * m


def _round_down(x: int, m: int) -> int:
  return (x // m) * m


def _tpu_vmem_capacity_bytes() -> int:
  """Physical VMEM per TensorCore; conservative fallback if query fails."""
  try:
    cap = getattr(pltpu.get_tpu_info(), "vmem_capacity_bytes", None)
    if cap:
      return int(cap)
  except Exception:
    pass
  return 64 << 20  # conservative (v7x per-core VMEM)


def _tpu_is_multicore() -> bool:
  """True on parts whose 'parallel' grid axes shard over >1 TensorCore."""
  try:
    info = pltpu.get_tpu_info()
    for attr in ("num_cores", "core_count", "tensorcore_count"):
      v = getattr(info, attr, None)
      if v is not None:
        return int(v) > 1
    cap = getattr(info, "vmem_capacity_bytes", None)
    if cap is not None:
      return int(cap) <= (64 << 20)   # v7x: 64 MiB/TC; v5e/v6e: 128 MiB
  except Exception:
    pass
  return False


def apply_mask_and_missing_pallas(z_val_emb: jax.Array,
                                  mask: jax.Array,
                                  missing: jax.Array,
                                  mask_emb: jax.Array,
                                  missing_emb: jax.Array,
                                  *,
                                  total_vmem_budget_bytes: int | None = None
                                  ) -> jax.Array:
  """Pallas wrapper. z_val_emb: [..., D]; mask/missing: [..., 1] bool."""
  orig_shape = z_val_emb.shape
  d = orig_shape[-1]
  n = math.prod(orig_shape[:-1])
  dtype = z_val_emb.dtype
  itemsize = jnp.dtype(dtype).itemsize

  # --- lane folding: fold g rows so the lane width is a multiple of 128 ----
  if d % 128 == 0:
    g = 1
  else:
    gg = 128 // math.gcd(d, 128)      # smallest g with (g*d) % 128 == 0
    g = gg if gg <= 16 else 1         # 2 bits/row must fit one uint32
    # TODO(synk): D needing fold > 16 rows falls back to masked lane stores;
    # could be fixed with a second packed-code sideband word.
  l = g * d

  # --- per-chip sizing ------------------------------------------------------
  vmem_cap = _tpu_vmem_capacity_bytes()
  if total_vmem_budget_bytes is None:
    total_vmem_budget_bytes = (40 << 20) if vmem_cap <= (80 << 20) else (56 << 20)
  multicore = _tpu_is_multicore()

  sublane = max(8, 32 // itemsize)    # 8 f32, 16 bf16, 32 int8/fp8
  # Real VMEM bytes per super-row (double-buffered): z tile + out tile + the
  # (tm, 1) uint32 code sideband (lane-padded to 128 lanes -> 512 B / row).
  bytes_per_srow = 2 * l * itemsize + 128 * 4
  ns = _cdiv(n, g)                    # number of super-rows

  tm_budget = max(sublane,
                  _round_down(total_vmem_budget_bytes // (2 * bytes_per_srow),
                              sublane))
  if ns <= sublane:
    tm = ns                           # block == full array dim (always legal)
  else:
    max_tm = _round_down(ns, sublane)   # largest aligned tile <= ns
    tm = min(tm_budget, max_tm)
    if multicore:
      # Prefer ~4 grid steps so each of the 2 TensorCores gets >=2 steps to
      # overlap prefetch with writeback.  No forced split on 1-TC chips.
      tm_mc = max(sublane, min(_round_up(_cdiv(ns, 4), sublane), max_tm))
      tm = min(tm, tm_mc)
  grid_m = _cdiv(ns, tm)              # Pallas masks the boundary block itself

  # --- wrapper-side prep (reshapes are free; code packing is O(N) ints) ----
  z2 = z_val_emb.reshape(n, d)
  code = (mask.reshape(n).astype(jnp.uint32) * 2
          + missing.reshape(n).astype(jnp.uint32))       # 0..3 per row
  n_fold = ns * g
  if n_fold != n:
    # Rare: N not a multiple of the fold factor -> one small pad/slice pass.
    z2 = jnp.pad(z2, ((0, n_fold - n), (0, 0)))
    code = jnp.pad(code, (0, n_fold - n))
  zs = z2.reshape(ns, l)

  # g 2-bit per-row codes packed into one uint32 per super-row.
  shifts = (2 * jnp.arange(g, dtype=jnp.uint32))[None, :]
  packed = jnp.sum(code.reshape(ns, g) << shifts, axis=1,
                   dtype=jnp.uint32).reshape(ns, 1)

  # Per-lane shift amounts 2*(lane//D); tiny, resident across grid steps.
  lane_shift = (2 * (jnp.arange(l, dtype=jnp.int32) // d)
                ).astype(jnp.uint32).reshape(1, l)

  # Both special tokens, tiled to the folded lane width; resident (2, L).
  emb = jnp.stack([
      jnp.tile(missing_emb.astype(dtype).reshape(-1), g),
      jnp.tile(mask_emb.astype(dtype).reshape(-1), g),
  ]).reshape(2, l)

  def kernel(z_ref, code_ref, shift_ref, emb_ref, o_ref):
    z = z_ref[...]                       # (tm, L)  native dtype
    packed_c = code_ref[...]             # (tm, 1)  uint32 packed 2-bit codes
    embs = emb_ref[...]                  # (2, L)   resident special tokens
    miss_e = embs[0:1, :]
    mask_e = embs[1:2, :]
    if g == 1:
      code2 = packed_c                   # (tm, 1): values 0..3, broadcasts
    else:
      # Single per-lane variable shift; constant VALU cost regardless of g.
      code2 = (packed_c >> shift_ref[...]) & jnp.uint32(3)   # (tm, L)
    out = jnp.where((code2 & jnp.uint32(1)) != 0, miss_e, z)  # missing
    out = jnp.where(code2 >= jnp.uint32(2), mask_e, out)      # mask overrides
    o_ref[...] = out

  needed_vmem = 2 * tm * bytes_per_srow + 4 * l * itemsize + (1 << 20)
  vmem_limit = max(total_vmem_budget_bytes + (8 << 20), needed_vmem)
  # TODO(synk): a single min-tile larger than physical VMEM (astronomical D)
  # would need a D-split grid; not handled here.

  out = pl.pallas_call(
      kernel,
      out_shape=jax.ShapeDtypeStruct((ns, l), dtype),
      grid_spec=pltpu.PrefetchScalarGridSpec(
          num_scalar_prefetch=0,
          grid=(grid_m,),
          in_specs=[
              pl.BlockSpec((tm, l), lambda i: (i, 0)),   # z (main stream)
              pl.BlockSpec((tm, 1), lambda i: (i, 0)),   # packed codes
              pl.BlockSpec((1, l), lambda i: (0, 0)),    # lane shifts (resident)
              pl.BlockSpec((2, l), lambda i: (0, 0)),    # special tokens (resident)
          ],
          out_specs=pl.BlockSpec((tm, l), lambda i: (i, 0)),
      ),
      compiler_params=pltpu.CompilerParams(
          dimension_semantics=("parallel",),
          vmem_limit_bytes=int(vmem_limit)),
  )(zs, packed, lane_shift, emb)

  out = out.reshape(n_fold, d)
  if n_fold != n:
    out = out[:n]
  return out.reshape(orig_shape)


class IngesTablesSpecialTokensPallas:
  """JAX port of IngesTablesSpecialTokens with deterministic init."""

  def __init__(self, z_val_dim: int, key: jax.Array):
    d_rsqrt = z_val_dim ** (-0.5)
    k_mask, k_miss = jax.random.split(key)
    # nn.init.uniform_(special_token, -d_rsqrt, d_rsqrt)
    self.mask_emb = jax.random.uniform(
        k_mask, (z_val_dim,), jnp.float32, minval=-d_rsqrt, maxval=d_rsqrt)
    self.missing_emb = jax.random.uniform(
        k_miss, (z_val_dim,), jnp.float32, minval=-d_rsqrt, maxval=d_rsqrt)

  def __call__(self, z_val_emb, mask, missing):
    return apply_mask_and_missing_pallas(
        z_val_emb, mask, missing, self.mask_emb, self.missing_emb)


def _reference(z_val_emb, mask, missing, mask_emb, missing_emb):
  """Pure-JAX reference mirroring apply_mask_and_missing (native dtype)."""
  bshape = (1,) * (z_val_emb.ndim - 1) + (z_val_emb.shape[-1],)
  miss_e = missing_emb.astype(z_val_emb.dtype).reshape(bshape)
  mask_e = mask_emb.astype(z_val_emb.dtype).reshape(bshape)
  out = jnp.where(missing, miss_e, z_val_emb)
  out = jnp.where(mask, mask_e, out)
  return out


if __name__ == "__main__":
  key = jax.random.PRNGKey(0)
  keys = jax.random.split(key, 10)

  # Case 1: f32, D=32 (< 128) -> lane folding g=4, L=128; N divisible by g.
  B, T, D = 2, 8, 32
  module = IngesTablesSpecialTokensPallas(D, keys[0])
  z_val_emb = jax.random.normal(keys[1], (B, T, D), jnp.float32)
  mask = jax.random.bernoulli(keys[2], 0.3, (B, T, 1))
  missing = jax.random.bernoulli(keys[3], 0.3, (B, T, 1))
  out = jax.block_until_ready(module(z_val_emb, mask, missing))
  ref = _reference(z_val_emb, mask, missing, module.mask_emb,
                   module.missing_emb)
  assert out.shape == (B, T, D) and out.dtype == z_val_emb.dtype
  assert bool(jnp.array_equal(out, ref)), "mismatch vs reference (f32, D=32)"

  # Case 2: bf16, D=128 (lane-dense g=1), B*T=26 not a tile multiple ->
  # exercises the no-pad cdiv grid with a partial boundary block.
  B2, T2, D2 = 2, 13, 128
  module2 = IngesTablesSpecialTokensPallas(D2, keys[0])
  z2 = jax.random.normal(keys[4], (B2, T2, D2), jnp.bfloat16)
  mask2 = jax.random.bernoulli(keys[5], 0.3, (B2, T2, 1))
  miss2 = jax.random.bernoulli(keys[6], 0.3, (B2, T2, 1))
  out2 = jax.block_until_ready(module2(z2, mask2, miss2))
  ref2 = _reference(z2, mask2, miss2, module2.mask_emb, module2.missing_emb)
  assert out2.shape == (B2, T2, D2) and out2.dtype == jnp.bfloat16
  assert bool(jnp.array_equal(out2, ref2)), "mismatch vs reference (bf16)"

  # Case 3: f32, D=96 (gcd fold g=4, L=384), N=5 not a multiple of g ->
  # exercises the rare fold-pad path.
  B3, T3, D3 = 1, 5, 96
  module3 = IngesTablesSpecialTokensPallas(D3, keys[0])
  z3 = jax.random.normal(keys[7], (B3, T3, D3), jnp.float32)
  mask3 = jax.random.bernoulli(keys[8], 0.3, (B3, T3, 1))
  miss3 = jax.random.bernoulli(keys[9], 0.3, (B3, T3, 1))
  out3 = jax.block_until_ready(module3(z3, mask3, miss3))
  ref3 = _reference(z3, mask3, miss3, module3.mask_emb, module3.missing_emb)
  assert out3.shape == (B3, T3, D3) and out3.dtype == jnp.float32
  assert bool(jnp.array_equal(out3, ref3)), "mismatch vs reference (D=96)"

  print("KERNEL_OK")
</pallas_src>

<mosaic_0001>
module attributes {stable_mosaic.version = 11 : i64} {
  func.func @kernel(%arg0: i32, %arg1: memref<4x128xf32, #tpu.memory_space<vmem>>, %arg2: memref<4x1xi32, #tpu.memory_space<vmem>>, %arg3: memref<1x128xi32, #tpu.memory_space<vmem>>, %arg4: memref<2x128xf32, #tpu.memory_space<vmem>>, %arg5: memref<4x128xf32, #tpu.memory_space<vmem>>) attributes {dimension_semantics = [#tpu.dimension_semantics<parallel>], iteration_bounds = array<i64: 1>, scalar_prefetch = 0 : i64, scratch_operands = 0 : i64, tpu.core_type = #tpu.core_type<tc>, window_params = [{transform_indices = @transform_0, window_bounds = array<i64: 4, 128>}, {transform_indices = @transform_1, window_bounds = array<i64: 4, 1>}, {pipeline_mode = #tpu.pipeline_mode<synchronous>, transform_indices = @transform_2, window_bounds = array<i64: 1, 128>}, {pipeline_mode = #tpu.pipeline_mode<synchronous>, transform_indices = @transform_3, window_bounds = array<i64: 2, 128>}, {transform_indices = @transform_4, window_bounds = array<i64: 4, 128>}]} {
    %c0 = arith.constant 0 : index
    %c0_0 = arith.constant 0 : index
    %0 = vector.load %arg1[%c0, %c0_0] : memref<4x128xf32, #tpu.memory_space<vmem>>, vector<4x128xf32>
    %c0_1 = arith.constant 0 : index
    %c0_2 = arith.constant 0 : index
    %1 = vector.load %arg2[%c0_1, %c0_2] : memref<4x1xi32, #tpu.memory_space<vmem>>, vector<4x1xi32>
    %c0_3 = arith.constant 0 : index
    %c0_4 = arith.constant 0 : index
    %2 = vector.load %arg4[%c0_3, %c0_4] : memref<2x128xf32, #tpu.memory_space<vmem>>, vector<2x128xf32>
    %3 = vector.extract_strided_slice %2 {offsets = [0, 0], sizes = [1, 128], strides = [1, 1]} : vector<2x128xf32> to vector<1x128xf32>
    %4 = vector.extract_strided_slice %2 {offsets = [1, 0], sizes = [1, 128], strides = [1, 1]} : vector<2x128xf32> to vector<1x128xf32>
    %c0_5 = arith.constant 0 : index
    %c0_6 = arith.constant 0 : index
    %5 = vector.load %arg3[%c0_5, %c0_6] : memref<1x128xi32, #tpu.memory_space<vmem>>, vector<1x128xi32>
    %6 = vector.broadcast %1 : vector<4x1xi32> to vector<4x128xi32>
    %7 = vector.broadcast %5 : vector<1x128xi32> to vector<4x128xi32>
    %8 = arith.shrui %6, %7 : vector<4x128xi32>
    %c3_i32 = arith.constant 3 : i32
    %9 = vector.broadcast %c3_i32 : i32 to vector<4x128xi32>
    %10 = arith.andi %8, %9 : vector<4x128xi32>
    %c1_i32 = arith.constant 1 : i32
    %11 = vector.broadcast %c1_i32 : i32 to vector<4x128xi32>
    %12 = arith.andi %10, %11 : vector<4x128xi32>
    %c0_i32 = arith.constant 0 : i32
    %13 = vector.broadcast %c0_i32 : i32 to vector<4x128xi32>
    %14 = arith.cmpi ne, %12, %13 : vector<4x128xi32>
    %15 = vector.shape_cast %3 : vector<1x128xf32> to vector<1x128xf32>
    %16 = vector.broadcast %15 : vector<1x128xf32> to vector<4x128xf32>
    %17 = arith.select %14, %16, %0 : vector<4x128xi1>, vector<4x128xf32>
    %c2_i32 = arith.constant 2 : i32
    %18 = vector.broadcast %c2_i32 : i32 to vector<4x128xi32>
    %19 = arith.cmpi uge, %10, %18 : vector<4x128xi32>
    %20 = vector.shape_cast %4 : vector<1x128xf32> to vector<1x128xf32>
    %21 = vector.broadcast %20 : vector<1x128xf32> to vector<4x128xf32>
    %22 = arith.select %19, %21, %17 : vector<4x128xi1>, vector<4x128xf32>
    %c0_7 = arith.constant 0 : index
    %c0_8 = arith.constant 0 : index
    %23 = vector.load %arg5[%c0_7, %c0_8] : memref<4x128xf32, #tpu.memory_space<vmem>>, vector<4x128xf32>
    tpu.vector_store %arg5[%c0_7, %c0_8], %22 {strides = array<i32>} : memref<4x128xf32, #tpu.memory_space<vmem>>, vector<4x128xf32>,
    return
  }
  func.func @transform_0(%arg0: i32) -> (i32, i32) {
    %c0_i32 = arith.constant 0 : i32
    %c0_i32_0 = arith.constant 0 : i32
    return %arg0, %c0_i32 : i32, i32
  }
  func.func @transform_1(%arg0: i32) -> (i32, i32) {
    %c0_i32 = arith.constant 0 : i32
    %c0_i32_0 = arith.constant 0 : i32
    return %arg0, %c0_i32 : i32, i32
  }
  func.func @transform_2(%arg0: i32) -> (i32, i32) {
    %c0_i32 = arith.constant 0 : i32
    %c0_i32_0 = arith.constant 0 : i32
    %c0_i32_1 = arith.constant 0 : i32
    return %c0_i32, %c0_i32_0 : i32, i32
  }
  func.func @transform_3(%arg0: i32) -> (i32, i32) {
    %c0_i32 = arith.constant 0 : i32
    %c0_i32_0 = arith.constant 0 : i32
    %c0_i32_1 = arith.constant 0 : i32
    return %c0_i32, %c0_i32_0 : i32, i32
  }
  func.func @transform_4(%arg0: i32) -> (i32, i32) {
    %c0_i32 = arith.constant 0 : i32
    %c0_i32_0 = arith.constant 0 : i32
    return %arg0, %c0_i32 : i32, i32
  }
}

</mosaic_0001>

<bundles_post_ra>
// kernel: tpu_custom_call.1
= control target key start
LH: loop header
LB: loop body
LE: loop exit
PB: predicated region body
PF: predicated region fallthrough
CT: control target
= control target key end

     0   :  { %v87_v1 = vmov 0   ;;  %s138_s0 = inlined_call_operand.vmem [shape: f32[4,128], index: 0, kind: input, shape index: {}]   ;;  %s139_s1 = inlined_call_operand.vmem [shape: u32[4,1], index: 1, kind: input, shape index: {}]   ;;  %s140_s2 = inlined_call_operand.vmem [shape: u32[1,128], index: 2, kind: input, shape index: {}]   ;;  %s141_s3 = inlined_call_operand.vmem [shape: f32[2,128], index: 3, kind: input, shape index: {}]   ;;  %s142_s4 = inlined_call_operand.hbm [shape: f32[4,128], index: 4, kind: output, shape index: {}]  }
   0x1   :  { %v19_v0 = vld [vmem:[%s139_s1] sm:$0xf]  ;;  %62 = vset.pattern.permute.xlu0 %v87_v1 }
   0x2   :  { %9 = vsyncpa [#allocation3], 0  ;;  %23 = vperm.xlu0 %62, %v19_v0   ;;  %v33_v2 = vlaneseq  ;;  %v59_v4 = vld [vmem:[%s140_s2] ss:$0 sm:$0xff]  ;;  %s88_s22 = smov [#allocation2]  }
   0x3   :  { %v20_v8 = vld [vmem:[%s141_s3] sm:$0x3]  ;;  %s51_s23 = sshll.u32 %s88_s22, 4  ;;  %s52_s23 = int_to_ptr.vmem [resolvable:$true] %s51_s23 }
   0x4   :  { %v34_v3 = vshrl.u32 %v33_v2, 7  ;;  %v18_v13 = vld [vmem:[%s138_s0] sm:$0xf]  ;;  %s63_s2 = scalar_lea.vmem %s52_s23, 64  ;;  %p68_p1 = scmp.lt.s32.totalorder %s52_s23, %s52_s23 }
   0x5   :  { %p64_p0 = scmp.ne.s32.totalorder %s52_s23, %s63_s2  ;;  %p69_p2 = scmp.lt.s32.totalorder %s63_s2, %s63_s2 }
   0x6   :  { %v35_v6 = vsub.s32 0, %v34_v3  ;;  %v41_v9 = vsub.s32 1, %v34_v3 }
   0x7   :  { %p70_p3 = por %p69_p2, %p68_p1 }
   0x8   :  { %v36_v11 = vrot.slane %v20_v8, %v35_v6  ;;  %v42_v14 = vrot.slane %v20_v8, %v41_v9 }
   0x9   :  { %p71_p4 = pnand %p70_p3, %p64_p0 }
  0x81   :  { %v24_v5 = vpop.permute.xlu0 %23 }
  0x82   :  { %v29_v7 = vshrl.u32 %v24_v5, %v59_v4 }
  0x84   :  { %v30_v10 = vand.u32 3, %v29_v7 }
  0x86   :  { %v31_v12 = vand.u32 1, %v30_v10  ;;  %vm38_vm1 = vcmp.ge.u32.totalorder %v30_v10, 2 }
  0x88   :  { %vm32_vm0 = vcmp.ne.s32.totalorder %v31_v12, 0 }
  0x89   :  { %v37_v15 = vsel %vm32_vm0, %v36_v11, %v18_v13 }
  0x8a   :  { %v43_v16 = vsel %vm38_vm1, %v42_v14, %v37_v15 }
  0x8b   :  { %44 = vst [vmem:[#allocation2] sm:$0xf] %v43_v16 }
  0x8c   :  { %74 = shalt.err (!%p71_p4)
}
  0x8d   :  { %s75_s0 = scalar_lea.hbm %s142_s4, 64 }
  0x8e   :  { %p76_p5 = scmp.ne.s32.totalorder %s142_s4, %s75_s0  ;;  %p79_p6 = scmp.lt.u32.totalorder %s75_s0, %s142_s4 }
  0x90   :  { %p81_p7 = pnand %p79_p6, %p76_p5 }
  0x92   :  { %84 = shalt.err (!%p81_p7)
}
  0x93   :  { %54 = dma.vmem_to_hbm [thread:$0]  %s52_s23, 64, %s142_s4, [#allocation3]  }
  0x94   :  { %85 = dma.done.wait [#allocation3], 64  }
  0x95   :  { %86 = vsyncadd [#allocation3], 4294967232 }
  0x96   :  { %58 = vsyncpa [#allocation3], 1 }

</bundles_post_ra>
